<compile_context>
chip_gen: v7x
topology: tpu7x:2x2x1
jax: 0.10.0
libtpu: 0.0.40
codegen_flags: <defaults>
</compile_context>

<pallas_src>
import math
import functools

import jax
import jax.numpy as jnp
import numpy as np
from jax import lax
from jax.experimental import pallas as pl
from jax.experimental.pallas import tpu as pltpu


# ----------------------------------------------------------------------------
# helpers: VMEM capacity, tile selection (v5e/v6e = 128 MiB VMEM, v7x = 64 MiB)
# ----------------------------------------------------------------------------
def _vmem_capacity_bytes():
    try:
        return int(getattr(pltpu.get_tpu_info(), "vmem_capacity_bytes", 128 * 2**20))
    except Exception:
        return 128 * 2**20


def _default_tiles():
    cap = _vmem_capacity_bytes()
    if cap <= 64 * 2**20:             # v7x-class (64 MiB VMEM): halve attention tiles
        return 512, 512, 512, 2048    # (tq, tk, tn_qkv, tn_stats)
    return 1024, 1024, 1024, 4096     # v5e / v6e (128 MiB VMEM)


def _vmem_limit_bytes():
    # ~96 MiB on 128 MiB parts, ~48 MiB on 64 MiB parts: generous headroom so
    # Mosaic never clamps the pipeline at the (too small) default scoped limit.
    return int(0.75 * _vmem_capacity_bytes())


def _pick_tile(n, target, mult=128):
    """Largest divisor of n <= target that is a multiple of `mult`; falls back
    to multiples of 8 only for awkward n (asserts a sane minimum)."""
    t = min(n, target)
    t -= t % mult
    while t >= mult and n % t:
        t -= mult
    if t >= mult and n % t == 0:
        return t
    t = min(n, target)
    t -= t % 8
    while t >= 8 and n % t:
        t -= 8
    assert t >= 8 and n % t == 0, f"token count {n} must be a multiple of 8"
    return t


# ----------------------------------------------------------------------------
# Kernel 1: per-channel sum and sum-of-squares (GroupNorm statistics)
#   single merged (B, 2, C) output: row 0 = sum(x), row 1 = sum(x*x)
# ----------------------------------------------------------------------------
def _stats_kernel(x_ref, s_ref):
    @pl.when(pl.program_id(1) == 0)
    def _():
        s_ref[...] = jnp.zeros_like(s_ref)

    x = x_ref[0].astype(jnp.float32)                  # (tn, C)
    s_ref[0, 0:1] += jnp.sum(x, axis=0, keepdims=True)
    s_ref[0, 1:2] += jnp.sum(x * x, axis=0, keepdims=True)


# ----------------------------------------------------------------------------
# Kernel 2: GroupNorm affine (precomputed scale/shift) + QKV projection.
#   Lane-dense (B, N, C) bf16 outputs; sm_scale folded into Q here.
# ----------------------------------------------------------------------------
def _qkv_kernel(x_ref, scale_ref, shift_ref, wqkv_ref, bqkv_ref,
                q_ref, k_ref, v_ref, *, channels, sm_scale):
    C = channels
    x = x_ref[0].astype(jnp.float32)                  # (tn, C)
    xn = x * scale_ref[0] + shift_ref[0]              # GroupNorm folded to scale/shift

    # bf16 MXU operands, f32 accumulation.
    qkv = jnp.dot(xn.astype(jnp.bfloat16), wqkv_ref[...],
                  preferred_element_type=jnp.float32) + bqkv_ref[...]   # (tn, 3C)

    # Lane-dense full-C stores (no per-head D-wide masked stores).
    q_ref[0] = (qkv[:, 0 * C:1 * C] * sm_scale).astype(q_ref.dtype)
    k_ref[0] = qkv[:, 1 * C:2 * C].astype(k_ref.dtype)
    v_ref[0] = qkv[:, 2 * C:3 * C].astype(v_ref.dtype)


# ----------------------------------------------------------------------------
# Kernel 3: flash attention (online softmax), heads folded into the body.
#   grid = (B, q_tiles, kv_tiles); kv_tiles is the accumulation axis.
#   Per-head m/l state: (tq, num_heads) scratch.  Head-concat accumulator:
#   (tq, C) scratch -> ONE (tq,C)@(C,C) out-projection + bias + residual
#   at the last kv step.
# ----------------------------------------------------------------------------
def _flash_attn_kernel(q_ref, k_ref, v_ref, x_ref, wproj_ref, bproj_ref, o_ref,
                       m_sc, l_sc, acc_sc, *, num_heads):
    ki = pl.program_id(2)
    nk = pl.num_programs(2)
    C = acc_sc.shape[-1]
    D = C // num_heads

    @pl.when(ki == 0)
    def _():                                          # new (batch, q_tile): reset state
        m_sc[...] = jnp.full_like(m_sc, -jnp.inf)
        l_sc[...] = jnp.zeros_like(l_sc)
        acc_sc[...] = jnp.zeros_like(acc_sc)

    q = q_ref[0]                                      # (tq, C) bf16, sm_scale pre-folded
    k = k_ref[0]                                      # (tk, C) bf16
    v = v_ref[0]                                      # (tk, C) bf16

    for h in range(num_heads):                        # static unrolled head loop
        sl = slice(h * D, (h + 1) * D)
        # q_h @ k_h^T without explicit transpose (contract D of both operands).
        s = lax.dot_general(q[:, sl], k[:, sl], (((1,), (1,)), ((), ())),
                            preferred_element_type=jnp.float32)          # (tq, tk)

        m_prev = m_sc[:, h:h + 1]                     # (tq, 1)
        m_new = jnp.maximum(m_prev, jnp.max(s, axis=-1, keepdims=True))
        alpha = jnp.exp(m_prev - m_new)
        p = jnp.exp(s - m_new)                        # (tq, tk)

        l_sc[:, h:h + 1] = alpha * l_sc[:, h:h + 1] + jnp.sum(p, axis=-1, keepdims=True)
        acc_sc[:, sl] = alpha * acc_sc[:, sl] + jnp.dot(
            p.astype(jnp.bfloat16), v[:, sl], preferred_element_type=jnp.float32)
        m_sc[:, h:h + 1] = m_new

    @pl.when(ki == nk - 1)
    def _():                                          # finalize: normalize, out-proj, residual
        for h in range(num_heads):
            sl = slice(h * D, (h + 1) * D)
            acc_sc[:, sl] = acc_sc[:, sl] * pl.reciprocal(l_sc[:, h:h + 1])
        attn = acc_sc[...].astype(jnp.bfloat16)       # (tq, C) head-concat
        out = (x_ref[0].astype(jnp.float32) +
               jnp.dot(attn, wproj_ref[...], preferred_element_type=jnp.float32) +
               bproj_ref[...])
        o_ref[0] = out.astype(o_ref.dtype)


# ----------------------------------------------------------------------------
# Wrapper (layout plumbing + three pallas_calls)
# ----------------------------------------------------------------------------
def nonlocal_attention_wrap(vid, params, *, num_heads, num_groups, flows=None):
    """vid: (B, T, C, H, W) float32. Returns same shape/dtype."""
    del flows  # TODO(synk): stnls flow-guided top-k search not implemented (flows=None only).
    B, T, C, H, W = vid.shape
    N = T * H * W
    D = C // num_heads
    assert C % num_heads == 0 and C % num_groups == 0
    assert N % 8 == 0, "token count T*H*W must be a multiple of 8"

    gamma, beta, wqkv, bqkv, wproj, bproj = params

    # (B, T, C, H, W) -> tokens (B, N, C) channels-last.
    # TODO(synk): a production pipeline should stay channels-last end-to-end to
    #             avoid these two full-HBM transposes around the kernels.
    x = jnp.transpose(vid, (0, 1, 3, 4, 2)).reshape(B, N, C)

    tq_t, tk_t, tn_qkv_t, tn_stats_t = _default_tiles()
    tq = _pick_tile(N, tq_t)
    tk = _pick_tile(N, tk_t)
    tn = _pick_tile(N, tn_qkv_t)
    tns = _pick_tile(N, tn_stats_t)
    QT, KT, NT, NTS = N // tq, N // tk, N // tn, N // tns
    vmem_limit = _vmem_limit_bytes()

    # ---- Kernel 1: GroupNorm statistics (single (B,2,C) output) -------------
    stats = pl.pallas_call(
        _stats_kernel,
        out_shape=jax.ShapeDtypeStruct((B, 2, C), jnp.float32),
        grid=(B, NTS),
        in_specs=[pl.BlockSpec((1, tns, C), lambda b, t: (b, t, 0))],
        out_specs=pl.BlockSpec((1, 2, C), lambda b, t: (b, 0, 0)),
        compiler_params=pltpu.CompilerParams(
            dimension_semantics=("parallel", "arbitrary"),
            vmem_limit_bytes=vmem_limit),
    )(x)
    s1 = stats[:, 0, :]                                          # (B, C)
    s2 = stats[:, 1, :]                                          # (B, C)

    # Tiny O(B*C) glue: fold per-group mean/rstd + GN affine into per-channel
    # scale/shift (single-pass E[x^2]-E[x]^2 form; f32 accumulation).
    cg = C // num_groups
    cnt = float(N * cg)
    s1g = s1.reshape(B, num_groups, cg).sum(-1)
    s2g = s2.reshape(B, num_groups, cg).sum(-1)
    mean_g = s1g / cnt
    var_g = jnp.maximum(s2g / cnt - mean_g * mean_g, 0.0)
    rstd_g = lax.rsqrt(var_g + 1e-5)
    mean_c = jnp.repeat(mean_g, cg, axis=-1)                     # (B, C)
    rstd_c = jnp.repeat(rstd_g, cg, axis=-1)                     # (B, C)
    g_row = gamma.reshape(1, C)
    scale_c = (g_row * rstd_c).reshape(B, 1, C)
    shift_c = (beta.reshape(1, C) - mean_c * g_row * rstd_c).reshape(B, 1, C)

    # bf16 weights for the MXU fast path (f32 accumulation inside kernels).
    wqkv_b = wqkv.astype(jnp.bfloat16)                           # (C, 3C)
    wproj_b = wproj.astype(jnp.bfloat16)                         # (C, C)

    # ---- Kernel 2: normalize + QKV projection, lane-dense (B,N,C) bf16 ------
    q, k, v = pl.pallas_call(
        functools.partial(_qkv_kernel, channels=C, sm_scale=1.0 / math.sqrt(D)),
        out_shape=(jax.ShapeDtypeStruct((B, N, C), jnp.bfloat16),) * 3,
        grid=(B, NT),
        in_specs=[
            pl.BlockSpec((1, tn, C), lambda b, t: (b, t, 0)),    # x tokens
            pl.BlockSpec((1, 1, C), lambda b, t: (b, 0, 0)),     # scale
            pl.BlockSpec((1, 1, C), lambda b, t: (b, 0, 0)),     # shift
            pl.BlockSpec((C, 3 * C), lambda b, t: (0, 0)),       # W_qkv (bf16)
            pl.BlockSpec((1, 3 * C), lambda b, t: (0, 0)),       # b_qkv
        ],
        out_specs=(pl.BlockSpec((1, tn, C), lambda b, t: (b, t, 0)),) * 3,
        compiler_params=pltpu.CompilerParams(
            dimension_semantics=("parallel", "parallel"),
            vmem_limit_bytes=vmem_limit),
    )(x, scale_c, shift_c, wqkv_b, bqkv)

    # ---- Kernel 3: flash attention (heads in body) + out-proj + residual ----
    # Megacore note (v7x): B and QT are both "parallel"; B>=2 or QT>=2 keeps
    # both TensorCores busy.
    out = pl.pallas_call(
        functools.partial(_flash_attn_kernel, num_heads=num_heads),
        out_shape=jax.ShapeDtypeStruct((B, N, C), vid.dtype),
        grid=(B, QT, KT),
        in_specs=[
            pl.BlockSpec((1, tq, C), lambda b, qi, ki: (b, qi, 0)),   # q (scaled)
            pl.BlockSpec((1, tk, C), lambda b, qi, ki: (b, ki, 0)),   # k
            pl.BlockSpec((1, tk, C), lambda b, qi, ki: (b, ki, 0)),   # v
            pl.BlockSpec((1, tq, C), lambda b, qi, ki: (b, qi, 0)),   # residual x
            pl.BlockSpec((C, C), lambda b, qi, ki: (0, 0)),           # W_proj (bf16)
            pl.BlockSpec((1, C), lambda b, qi, ki: (0, 0)),           # b_proj
        ],
        out_specs=pl.BlockSpec((1, tq, C), lambda b, qi, ki: (b, qi, 0)),
        scratch_shapes=[
            pltpu.VMEM((tq, num_heads), jnp.float32),   # m (running max per head)
            pltpu.VMEM((tq, num_heads), jnp.float32),   # l (running denom per head)
            pltpu.VMEM((tq, C), jnp.float32),           # head-concat attention accumulator
        ],
        compiler_params=pltpu.CompilerParams(
            dimension_semantics=("parallel", "parallel", "arbitrary"),
            vmem_limit_bytes=vmem_limit),
    )(q, k, v, x, wproj_b, bproj)

    # tokens (B, N, C) -> (B, T, C, H, W)
    return jnp.transpose(out.reshape(B, T, H, W, C), (0, 1, 4, 2, 3))


# ----------------------------------------------------------------------------
# Pure-JAX reference (same math) for a correctness check
# ----------------------------------------------------------------------------
def _reference(vid, params, *, num_heads, num_groups):
    gamma, beta, wqkv, bqkv, wproj, bproj = params
    B, T, C, H, W = vid.shape
    N = T * H * W
    x = jnp.transpose(vid, (0, 1, 3, 4, 2)).reshape(B, N, C).astype(jnp.float32)
    G, cg = num_groups, C // num_groups
    xg = x.reshape(B, N, G, cg)
    mean = jnp.mean(xg, axis=(1, 3), keepdims=True)
    var = jnp.mean((xg - mean) ** 2, axis=(1, 3), keepdims=True)
    xn = ((xg - mean) / jnp.sqrt(var + 1e-5)).reshape(B, N, C) * gamma + beta
    qkv = jnp.einsum("bnc,cd->bnd", xn, wqkv, precision="highest") + bqkv
    q, k, v = jnp.split(qkv, 3, axis=-1)
    D = C // num_heads
    q = q.reshape(B, N, num_heads, D)
    k = k.reshape(B, N, num_heads, D)
    v = v.reshape(B, N, num_heads, D)
    logits = jnp.einsum("bnhd,bmhd->bhnm", q, k, precision="highest") / math.sqrt(D)
    p = jax.nn.softmax(logits, axis=-1)
    a = jnp.einsum("bhnm,bmhd->bnhd", p, v, precision="highest").reshape(B, N, C)
    out = jnp.einsum("bnc,cd->bnd", a, wproj, precision="highest") + bproj
    y = x + out
    return jnp.transpose(y.reshape(B, T, H, W, C), (0, 1, 4, 2, 3)).astype(vid.dtype)


# ----------------------------------------------------------------------------
if __name__ == "__main__":
    # Small, module-consistent shapes: video (B, T, C, H, W); N = T*H*W = 128.
    B, T, C, H, W = 2, 2, 32, 8, 8
    num_heads = 4          # channels % num_heads == 0
    num_groups = 4         # GroupNorm groups

    key = jax.random.PRNGKey(0)
    k_vid, k_qkv, k_bq, k_pr, k_bp = jax.random.split(key, 5)

    vid = jax.random.normal(k_vid, (B, T, C, H, W), dtype=jnp.float32)

    # Deterministic synthetic parameters (no checkpoint loading).
    gamma = jnp.ones((1, C), jnp.float32)
    beta = jnp.zeros((1, C), jnp.float32)
    wqkv = 0.05 * jax.random.normal(k_qkv, (C, 3 * C), dtype=jnp.float32)
    bqkv = 0.01 * jax.random.normal(k_bq, (1, 3 * C), dtype=jnp.float32)
    wproj = 0.05 * jax.random.normal(k_pr, (C, C), dtype=jnp.float32)
    bproj = 0.01 * jax.random.normal(k_bp, (1, C), dtype=jnp.float32)
    params = (gamma, beta, wqkv, bqkv, wproj, bproj)

    out = nonlocal_attention_wrap(vid, params, num_heads=num_heads,
                                  num_groups=num_groups, flows=None)
    out = jax.block_until_ready(out)

    ref = jax.block_until_ready(
        _reference(vid, params, num_heads=num_heads, num_groups=num_groups))

    assert out.shape == vid.shape and out.dtype == vid.dtype
    np.testing.assert_allclose(np.asarray(out), np.asarray(ref),
                               atol=1e-2, rtol=1e-2)
    print("KERNEL_OK")
</pallas_src>

<mosaic_0001>
module attributes {stable_mosaic.version = 11 : i64} {
  func.func @_stats_kernel(%arg0: i32, %arg1: i32, %arg2: memref<1x128x32xf32, #tpu.memory_space<vmem>>, %arg3: memref<1x2x32xf32, #tpu.memory_space<vmem>>) attributes {dimension_semantics = [#tpu.dimension_semantics<parallel>, #tpu.dimension_semantics<arbitrary>], iteration_bounds = array<i64: 2, 1>, scalar_prefetch = 0 : i64, scratch_operands = 0 : i64, tpu.core_type = #tpu.core_type<tc>, window_params = [{transform_indices = @transform_0, window_bounds = array<i64: 1, 128, 32>}, {transform_indices = @transform_1, window_bounds = array<i64: 1, 2, 32>}]} {
    %c0_i32 = arith.constant 0 : i32
    %0 = arith.cmpi eq, %arg1, %c0_i32 : i32
    %1 = arith.extui %0 : i1 to i32
    %c0_i32_0 = arith.constant 0 : i32
    %2 = arith.cmpi ne, %1, %c0_i32_0 : i32
    scf.if %2 {
      %cst_15 = arith.constant 0.000000e+00 : f32
      %22 = vector.broadcast %cst_15 : f32 to vector<1x2x32xf32>
      %c0_16 = arith.constant 0 : index
      %c0_17 = arith.constant 0 : index
      %c0_18 = arith.constant 0 : index
      %23 = vector.load %arg3[%c0_16, %c0_17, %c0_18] : memref<1x2x32xf32, #tpu.memory_space<vmem>>, vector<1x2x32xf32>
      tpu.vector_store %arg3[%c0_16, %c0_17, %c0_18], %22 {strides = array<i32>} : memref<1x2x32xf32, #tpu.memory_space<vmem>>, vector<1x2x32xf32>,
    } else {
    }
    %c0 = arith.constant 0 : index
    %c0_1 = arith.constant 0 : index
    %c0_2 = arith.constant 0 : index
    %3 = vector.load %arg2[%c0, %c0_1, %c0_2] : memref<1x128x32xf32, #tpu.memory_space<vmem>>, vector<1x128x32xf32>
    %4 = vector.shape_cast %3 : vector<1x128x32xf32> to vector<128x32xf32>
    %c0_3 = arith.constant 0 : index
    %c0_4 = arith.constant 0 : index
    %c0_5 = arith.constant 0 : index
    %5 = vector.load %arg3[%c0_3, %c0_4, %c0_5] : memref<1x2x32xf32, #tpu.memory_space<vmem>>, vector<1x1x32xf32>
    %6 = vector.shape_cast %5 : vector<1x1x32xf32> to vector<1x32xf32>
    %cst = arith.constant dense<0.000000e+00> : vector<32xf32>
    %7 = vector.multi_reduction <add>, %4, %cst [0] : vector<128x32xf32> to vector<32xf32>
    %8 = vector.shape_cast %7 : vector<32xf32> to vector<1x32xf32>
    %9 = arith.addf %6, %8 : vector<1x32xf32>
    %c0_6 = arith.constant 0 : index
    %c0_7 = arith.constant 0 : index
    %c0_8 = arith.constant 0 : index
    %10 = vector.load %arg3[%c0_6, %c0_7, %c0_8] : memref<1x2x32xf32, #tpu.memory_space<vmem>>, vector<1x1x32xf32>
    %11 = vector.shape_cast %10 : vector<1x1x32xf32> to vector<1x32xf32>
    %12 = vector.shape_cast %9 : vector<1x32xf32> to vector<1x1x32xf32>
    tpu.vector_store %arg3[%c0_6, %c0_7, %c0_8], %12 {strides = array<i32>} : memref<1x2x32xf32, #tpu.memory_space<vmem>>, vector<1x1x32xf32>,
    %c0_9 = arith.constant 0 : index
    %c1 = arith.constant 1 : index
    %c0_10 = arith.constant 0 : index
    %13 = vector.load %arg3[%c0_9, %c1, %c0_10] : memref<1x2x32xf32, #tpu.memory_space<vmem>>, vector<1x1x32xf32>
    %14 = vector.shape_cast %13 : vector<1x1x32xf32> to vector<1x32xf32>
    %15 = arith.mulf %4, %4 : vector<128x32xf32>
    %cst_11 = arith.constant dense<0.000000e+00> : vector<32xf32>
    %16 = vector.multi_reduction <add>, %15, %cst_11 [0] : vector<128x32xf32> to vector<32xf32>
    %17 = vector.shape_cast %16 : vector<32xf32> to vector<1x32xf32>
    %18 = arith.addf %14, %17 : vector<1x32xf32>
    %c0_12 = arith.constant 0 : index
    %c1_13 = arith.constant 1 : index
    %c0_14 = arith.constant 0 : index
    %19 = vector.load %arg3[%c0_12, %c1_13, %c0_14] : memref<1x2x32xf32, #tpu.memory_space<vmem>>, vector<1x1x32xf32>
    %20 = vector.shape_cast %19 : vector<1x1x32xf32> to vector<1x32xf32>
    %21 = vector.shape_cast %18 : vector<1x32xf32> to vector<1x1x32xf32>
    tpu.vector_store %arg3[%c0_12, %c1_13, %c0_14], %21 {strides = array<i32>} : memref<1x2x32xf32, #tpu.memory_space<vmem>>, vector<1x1x32xf32>,
    return
  }
  func.func @transform_0(%arg0: i32, %arg1: i32) -> (i32, i32, i32) {
    %c0_i32 = arith.constant 0 : i32
    %c0_i32_0 = arith.constant 0 : i32
    return %arg0, %arg1, %c0_i32 : i32, i32, i32
  }
  func.func @transform_1(%arg0: i32, %arg1: i32) -> (i32, i32, i32) {
    %c0_i32 = arith.constant 0 : i32
    %c0_i32_0 = arith.constant 0 : i32
    %c0_i32_1 = arith.constant 0 : i32
    return %arg0, %c0_i32, %c0_i32_0 : i32, i32, i32
  }
}

</mosaic_0001>

<bundles_post_ra>
// kernel: tpu_custom_call.1
= control target key start
LH: loop header
LB: loop body
LE: loop exit
PB: predicated region body
PF: predicated region fallthrough
CT: control target
= control target key end

     0   :  { %6 = vsyncpa [#allocation3], 0  ;;  %s808_s0 = inlined_call_operand.hbm [shape: f32[2,128,32], index: 0, kind: input, shape index: {}]   ;;  %s809_s1 = inlined_call_operand.hbm [shape: f32[2,2,32], index: 1, kind: output, shape index: {}]  }
   0x1   :  { %8 = vsyncpa [#allocation3 + $0x1], 0 }
   0x2   :  { %9 = vsyncpa [#allocation4], 0 }
   0x3   :  { %11 = vsyncpa [#allocation4 + $0x1], 0  ;;  %s576_s6 = smov 0   ;;  %s578_s7 = smov 0  }
   0x4   :  { %s580_s8 = smov 0   ;;  %s582_s9 = smov 0  }
   0x5   :  { %s584_s10 = smov 0   ;;  %s586_s11 = smov 0  }
   0x6 LB: > { %s367_s12 = sadd.s32 4294967295, %s559_s11   ;;  %s368_s13 = sadd.s32 4294967294, %s559_s11   ;;  %s559_s11 = sphi %s586_s11, %s17_s11   ;;  %s555_s10 = sphi %s584_s10, %s824_s10   ;;  %s551_s9 = sphi %s582_s9, %s823_s9   ;;  %s547_s8 = sphi %s580_s8, %s822_s8   ;;  %s543_s7 = sphi %s578_s7, %s821_s7   ;;  %s539_s6 = sphi %s576_s6, %s820_s6  }
   0x7   : > { %s29_s14 = sadd.s32 1, %s555_s10  ;;  %s38_s15 = sadd.s32 1, %s547_s8 }
   0x8   : > { %p31_p0 = scmp.ge.s32.totalorder %s29_s14, 2  ;;  %p45_p1 = scmp.ne.s32.totalorder %s547_s8, %s543_s7 }
   0x9   : > { %p46_p2 = scmp.eq.s32.totalorder %s559_s11, 0  ;;  %p51_p3 = scmp.ne.s32.totalorder %s543_s7, %s539_s6 }
   0xa   : > { %s826_s14 = smov (%p31_p0, %s29_s14), 0  ;;  %p52_p5 = scmp.eq.s32.totalorder %s367_s12, 0 }
   0xb   : > { %p617_p4 = por %p46_p2, %p45_p1  ;;  %s33_s17 = ssub.s32 %s555_s10, %s826_s14 }
   0xc   : > { %p75_p6 = scmp.eq.s32.totalorder %s367_s12, 1  ;;  %p36_p7 = scmp.eq.s32.totalorder %s33_s17, 0 }
   0xd   : > { %p623_p8 = por %p52_p5, %p51_p3  ;;  %p81_p10 = scmp.eq.s32.totalorder %s368_s13, 1 }
   0xe   : > { %p627_p9 = por %p75_p6, %p45_p1  ;;  %p394_p13 = scmp.lt.s32.totalorder %s559_s11, 2 }
   0xf   : > { %s632_s20 = scalar_select %p36_p7, %s547_s8, %s38_s15  }
  0x10   : > { %s813_s19 = scalar_select %p627_p9, 1, 0 }
  0x11   : > { %p634_p11 = por %p81_p10, %p51_p3  ;;  %s101_s22 = sand.u32 1, %s547_s8  }
  0x12   : > { %s371_s23 = sshll.u32 %s101_s22, 7  ;;  %s381_s24 = sshll.u32 %s555_s10, 11 }
  0x13   : > { %s814_s21 = scalar_select %p634_p11, 1, 0 }
  0x14   : > { %s645_s27 = scalar_lea.hbm %s808_s0, %s381_s24  ;;  %s105_s28 = scalar_lea.vmem [#allocation2], %s371_s23 }
  0x15   : > { %s114_s29 = sshll.u32 %s105_s28, 4  ;;  %p651_p0 = pnand %p394_p13, %p617_p4  ;;  %s647_s29 = int_to_ptr.vmem [resolvable:$true] %s114_s29 }
  0x16   : > { %s656_s2 = scalar_lea.sflag [#allocation3], %s101_s22  ;;  %s447_s3 = scalar_lea.hbm %s645_s27, 2048 }
  0x17   : > { %p448_p2 = scmp.ne.s32.totalorder %s645_s27, %s447_s3  ;;  %p449_p3 = pneg %p651_p0 }
  0x18   : > { %s452_s12 = scalar_lea.hbm %s808_s0, 4096  ;;  %p453_p4 = scmp.lt.u32.totalorder %s645_s27, %s808_s0 }
  0x19   : > { %p450_p5 = pnand %p449_p3, %p448_p2  ;;  %p454_p7 = scmp.lt.u32.totalorder %s452_s12, %s447_s3 }
  0x1a   : > { %p456_p13 = scmp.lt.u32.totalorder %s447_s3, %s645_s27 }
  0x1b   : > { %p451_p6 = pneg %p450_p5  ;;  %p455_p10 = por %p454_p7, %p453_p4 }
  0x1d   : > { %p457_p12 = por %p456_p13, %p455_p10 }
  0x1f   : > { %p458_p1 = pnand %p457_p12, %p451_p6 }
  0x21   : > { %461 = shalt.err (!%p458_p1)
}
  0x22   : > { %s462_s16 = scalar_lea.vmem %s647_s29, 2048  ;;  %s561_s17 = smov [#allocation2]  }
  0x23   : > { %p463_p2 = scmp.ne.s32.totalorder %s647_s29, %s462_s16  ;;  %s467_s22 = sshll.u32 %s561_s17, 4  ;;  %s468_s22 = int_to_ptr.vmem [resolvable:$false] %s467_s22 }
  0x24   : > { %s469_s23 = scalar_lea.vmem %s468_s22, 4096  ;;  %p470_p9 = scmp.lt.s32.totalorder %s647_s29, %s468_s22 }
  0x25   : > { %p465_p5 = pnand %p463_p2, %p449_p3  ;;  %p471_p4 = scmp.lt.s32.totalorder %s469_s23, %s462_s16 }
  0x27   : > { %p466_p11 = pneg %p465_p5  ;;  %p472_p7 = por %p471_p4, %p470_p9 }
  0x29   : > { %p473_p10 = pnand %p472_p7, %p466_p11 }
  0x2b   : > { %476 = shalt.err (!%p473_p10)
}
  0x2c   : > { %s562_s24 = smov 128   ;;  %s563_s25 = smov 8  }
  0x2d   : > { %389 = dma.hbm_to_vmem [thread:$0]  (!%p651_p0), %s645_s27, 2048, %s647_s29, %s656_s2, %s562_s24, %s562_s24, %s563_s25  }
  0x2e   : > { %p122_p12 = scmp.lt.s32.totalorder %s559_s11, 3  ;;  %p816_p1 = scmp.ge.s32.totalorder %s559_s11, 1 }
  0x30   : > { %p123_p3 = pnand %p816_p1, %p122_p12 }
  0x31   : > { %s688_s26 = sand.u32 (!%p123_p3), 1, %s543_s7  }
  0x32   : > { %126 = sbr.rel (%p123_p3) target bundleno = 122 (0x7a), region = 24  ;;  %s375_s28 = sshll.u32 (!%p123_p3), %s688_s26, 7 }
  0x33   : > { %s129_s3 = scalar_lea.sflag (!%p123_p3), [#allocation3], %s688_s26  ;;  %s692_s4 = scalar_lea.vmem (!%p123_p3), [#allocation2], %s375_s28 }
  0x39   : > { %530 = dma.done.wait (%p623_p8), %s129_s3, 2048  }
  0x3a   : > { %532 = vsyncadd (%p623_p8), %s129_s3, 4294965248  ;;  %s376_s27 = sshll.u32 %s688_s26, 1  ;;  %vm156_vm0 = vcmask 254976   ;;  %v564_v0 = vmov 0.0   ;;  %vm175_vm1 = vcmask 261120   ;;  %v158_v1 = vld [vmem:[%s692_s4] sm:$0xff] }
  0x3b   : > { %s699_s29 = scalar_lea.vmem [#allocation5], %s376_s27  ;;  %v159_v2 = vld [vmem:[%s692_s4 + $0x8] sm:$0xff]  ;;  %v160_v3 = vld [vmem:[%s692_s4 + $0x10] sm:$0xff]  ;;  %v176_v4 = vsel %vm175_vm1, %v158_v1, 0.0  ;;  %v161_v7 = vld [vmem:[%s692_s4 + $0x18] sm:$0xff]  ;;  %v217_v15 = vmul.f32 %v158_v1, %v158_v1  ;;  %vm214_vm2 = vcmask 253952  }
  0x3c   : > { %157 = vst.msk [vmem:[%s699_s29] sm:$0x3] %vm156_vm0, %v564_v0  ;;  %v177_v5 = vsel %vm175_vm1, %v159_v2, 0.0  ;;  %v179_v6 = vsel %vm175_vm1, %v160_v3, 0.0  ;;  %v181_v9 = vsel %vm175_vm1, %v161_v7, 0.0  ;;  %v162_v10 = vld [vmem:[%s692_s4 + $0x20] sm:$0xff]  ;;  %v218_v16 = vmul.f32 %v159_v2, %v159_v2 }
  0x3d   : > { %v178_v8 = vadd.f32 %v177_v5, %v176_v4  ;;  %v183_v12 = vsel %vm175_vm1, %v162_v10, 0.0  ;;  %v163_v13 = vld [vmem:[%s692_s4 + $0x28] sm:$0xff]  ;;  %v219_v17 = vmul.f32 %v160_v3, %v160_v3  ;;  %v164_v19 = vld [vmem:[%s692_s4 + $0x30] sm:$0xff]  ;;  %v220_v21 = vmul.f32 %v161_v7, %v161_v7  ;;  %v165_v24 = vld [vmem:[%s692_s4 + $0x38] sm:$0xff]  ;;  %s378_s18 = sshll.u32 %s551_s9, 5  ;;  %s286_s30 = sshll.u32 %s699_s29, 4  ;;  %s760_s30 = int_to_ptr.vmem [resolvable:$true] %s286_s30 }
  0x3e   : > { %v185_v18 = vsel %vm175_vm1, %v163_v13, 0.0  ;;  %v187_v22 = vsel %vm175_vm1, %v164_v19, 0.0  ;;  %v221_v23 = vmul.f32 %v162_v10, %v162_v10  ;;  %v233_v26 = vsel %vm175_vm1, %v217_v15, 0.0  ;;  %v166_v31 = vld [vmem:[%s692_s4 + $0x40] sm:$0xff]  ;;  %v167_v37 = vld [vmem:[%s692_s4 + $0x48] sm:$0xff]  ;;  %v168_v43 = vld [vmem:[%s692_s4 + $0x50] sm:$0xff]  ;;  %s758_s12 = scalar_lea.hbm %s809_s1, %s378_s18 }
  0x3f   : > { %v180_v11 = vadd.f32 %v179_v6, %v178_v8  ;;  %v234_v27 = vsel %vm175_vm1, %v218_v16, 0.0  ;;  %v236_v28 = vsel %vm175_vm1, %v219_v17, 0.0  ;;  %v189_v29 = vsel %vm175_vm1, %v165_v24, 0.0  ;;  %v169_v49 = vld [vmem:[%s692_s4 + $0x58] sm:$0xff]  ;;  %v170_v55 = vld [vmem:[%s692_s4 + $0x60] sm:$0xff]  ;;  %v171_v61 = vld [vmem:[%s692_s4 + $0x68] sm:$0xff] }
  0x40   : > { %v235_v30 = vadd.f32 %v234_v27, %v233_v26  ;;  %v222_v33 = vmul.f32 %v163_v13, %v163_v13  ;;  %v238_v34 = vsel %vm175_vm1, %v220_v21, 0.0  ;;  %v191_v35 = vsel %vm175_vm1, %v166_v31, 0.0  ;;  %v172_v3 = vld [vmem:[%s692_s4 + $0x70] sm:$0xff]  ;;  %s273_s13 = scalar_lea.sflag [#allocation4], %s688_s26  ;;  %s477_s15 = scalar_lea.vmem %s760_s30, 32 }
  0x41   : > { %v182_v14 = vadd.f32 %v181_v9, %v180_v11  ;;  %v223_v39 = vmul.f32 %v164_v19, %v164_v19  ;;  %v240_v40 = vsel %vm175_vm1, %v221_v23, 0.0  ;;  %v193_v41 = vsel %vm175_vm1, %v167_v37, 0.0  ;;  %v173_v9 = vld [vmem:[%s692_s4 + $0x78] sm:$0xff]  ;;  %p478_p8 = scmp.ne.s32.totalorder %s760_s30, %s477_s15  ;;  %p817_p9 = scmp.ne.s32.totalorder %s813_s19, 0 }
  0x42   : > { %v237_v36 = vadd.f32 %v236_v28, %v235_v30  ;;  %v224_v45 = vmul.f32 %v165_v24, %v165_v24  ;;  %v242_v46 = vsel %vm175_vm1, %v222_v33, 0.0  ;;  %v195_v47 = vsel %vm175_vm1, %v168_v43, 0.0  ;;  %s565_s9 = smov [#allocation5]  }
  0x43   : > { %v184_v20 = vadd.f32 %v183_v12, %v182_v14  ;;  %v225_v51 = vmul.f32 %v166_v31, %v166_v31  ;;  %v244_v52 = vsel %vm175_vm1, %v223_v39, 0.0  ;;  %v197_v53 = vsel %vm175_vm1, %v169_v49, 0.0  ;;  %p479_p11 = pnand %p478_p8, %p817_p9  ;;  %s481_s16 = sshll.u32 %s565_s9, 4  ;;  %s482_s16 = int_to_ptr.vmem [resolvable:$false] %s481_s16 }
  0x44   : > { %v239_v42 = vadd.f32 %v238_v34, %v237_v36  ;;  %v226_v57 = vmul.f32 %v167_v37, %v167_v37  ;;  %v246_v58 = vsel %vm175_vm1, %v224_v45, 0.0  ;;  %v199_v59 = vsel %vm175_vm1, %v170_v55, 0.0  ;;  %v174_v36 = vld [vmem:[%s699_s29] sm:$0x1]  ;;  %s483_s17 = scalar_lea.vmem %s482_s16, 64  ;;  %p484_p6 = scmp.lt.s32.totalorder %s760_s30, %s482_s16 }
  0x45   : > { %v186_v25 = vadd.f32 %v185_v18, %v184_v20  ;;  %v227_v63 = vmul.f32 %v168_v43, %v168_v43  ;;  %v248_v0 = vsel %vm175_vm1, %v225_v51, 0.0  ;;  %v201_v1 = vsel %vm175_vm1, %v171_v61, 0.0  ;;  %p480_p0 = pneg %p479_p11  ;;  %p485_p13 = scmp.lt.s32.totalorder %s483_s17, %s477_s15 }
  0x46   : > { %v241_v48 = vadd.f32 %v240_v40, %v239_v42  ;;  %v228_v5 = vmul.f32 %v169_v49, %v169_v49  ;;  %v250_v6 = vsel %vm175_vm1, %v226_v57, 0.0  ;;  %v203_v7 = vsel %vm175_vm1, %v172_v3, 0.0 }
  0x47   : > { %v188_v32 = vadd.f32 %v187_v22, %v186_v25  ;;  %v229_v11 = vmul.f32 %v170_v55, %v170_v55  ;;  %v252_v12 = vsel %vm175_vm1, %v227_v63, 0.0  ;;  %v205_v13 = vsel %vm175_vm1, %v173_v9, 0.0  ;;  %p486_p2 = por %p485_p13, %p484_p6 }
  0x48   : > { %v243_v54 = vadd.f32 %v242_v46, %v241_v48  ;;  %v230_v16 = vmul.f32 %v171_v61, %v171_v61  ;;  %v254_v17 = vsel %vm175_vm1, %v228_v5, 0.0  ;;  %v231_v20 = vmul.f32 %v172_v3, %v172_v3 }
  0x49   : > { %v190_v38 = vadd.f32 %v189_v29, %v188_v32  ;;  %v256_v21 = vsel %vm175_vm1, %v229_v11, 0.0  ;;  %v232_v24 = vmul.f32 %v173_v9, %v173_v9  ;;  %p487_p5 = pnand %p486_p2, %p480_p0 }
  0x4a   : > { %v245_v60 = vadd.f32 %v244_v52, %v243_v54  ;;  %v258_v25 = vsel %vm175_vm1, %v230_v16, 0.0  ;;  %v260_v28 = vsel %vm175_vm1, %v231_v20, 0.0 }
  0x4b   : > { %v192_v44 = vadd.f32 %v191_v35, %v190_v38  ;;  %v262_v31 = vsel %vm175_vm1, %v232_v24, 0.0 }
  0x4c   : > { %v247_v2 = vadd.f32 %v246_v58, %v245_v60 }
  0x4d   : > { %v194_v50 = vadd.f32 %v193_v41, %v192_v44  ;;  %v216_v44 = vld [vmem:[%s699_s29 + $0x1] sm:$0x1] }
  0x4e   : > { %v249_v8 = vadd.f32 %v248_v0, %v247_v2 }
  0x4f   : > { %v196_v56 = vadd.f32 %v195_v47, %v194_v50 }
  0x50   : > { %v251_v14 = vadd.f32 %v250_v6, %v249_v8 }
  0x51   : > { %v198_v62 = vadd.f32 %v197_v53, %v196_v56 }
  0x52   : > { %v253_v18 = vadd.f32 %v252_v12, %v251_v14 }
  0x53   : > { %v200_v4 = vadd.f32 %v199_v59, %v198_v62 }
  0x54   : > { %v255_v22 = vadd.f32 %v254_v17, %v253_v18 }
  0x55   : > { %v202_v10 = vadd.f32 %v201_v1, %v200_v4 }
  0x56   : > { %v257_v26 = vadd.f32 %v256_v21, %v255_v22 }
  0x57   : > { %v204_v15 = vadd.f32 %v203_v7, %v202_v10 }
  0x58   : > { %v259_v29 = vadd.f32 %v258_v25, %v257_v26 }
  0x59   : > { %v206_v19 = vadd.f32 %v205_v13, %v204_v15 }
  0x5a   : > { %v261_v32 = vadd.f32 %v260_v28, %v259_v29 }
  0x5b   : > { %v207_v23 = vrot.slane %v206_v19, 4 }
  0x5c   : > { %v263_v34 = vadd.f32 %v262_v31, %v261_v32 }
  0x5d   : > { %v208_v27 = vadd.f32 %v207_v23, %v206_v19 }
  0x5e   : > { %v264_v37 = vrot.slane %v263_v34, 4 }
  0x5f   : > { %v209_v30 = vrot.slane %v208_v27, 2 }
  0x60   : > { %v265_v39 = vadd.f32 %v264_v37, %v263_v34 }
  0x61   : > { %v210_v33 = vadd.f32 %v209_v30, %v208_v27 }
  0x62   : > { %v266_v41 = vrot.slane %v265_v39, 2 }
  0x63   : > { %v211_v35 = vrot.slane %v210_v33, 1 }
  0x64   : > { %v267_v42 = vadd.f32 %v266_v41, %v265_v39 }
  0x65   : > { %v212_v38 = vadd.f32 %v211_v35, %v210_v33 }
  0x66   : > { %v268_v43 = vrot.slane %v267_v42, 1 }
  0x67   : > { %v213_v40 = vadd.f32 %v212_v38, %v174_v36 }
  0x68   : > { %v269_v45 = vadd.f32 %v268_v43, %v267_v42 }
  0x69   : > { %215 = vst.msk [vmem:[%s699_s29] sm:$0x1] %vm214_vm2, %v213_v40 }
  0x6a   : > { %v270_v46 = vadd.f32 %v269_v45, %v216_v44 }
  0x6c   : > { %271 = vst.msk [vmem:[%s699_s29 + $0x1] sm:$0x1] %vm214_vm2, %v270_v46 }
  0x6d   : > { %490 = shalt.err (!%p487_p5)
}
  0x6e   : > { %s491_s22 = scalar_lea.hbm %s758_s12, 32  ;;  %s495_s25 = scalar_lea.hbm %s809_s1, 64 }
  0x6f   : > { %p492_p4 = scmp.ne.s32.totalorder %s758_s12, %s491_s22  ;;  %p496_p12 = scmp.lt.u32.totalorder %s758_s12, %s809_s1 }
  0x70   : > { %p497_p1 = scmp.lt.u32.totalorder %s495_s25, %s491_s22  ;;  %p499_p8 = scmp.lt.u32.totalorder %s491_s22, %s758_s12 }
  0x71   : > { %p493_p7 = pnand %p492_p4, %p817_p9 }
  0x72   : > { %p498_p3 = por %p497_p1, %p496_p12 }
  0x73   : > { %p494_p10 = pneg %p493_p7 }
  0x74   : > { %p500_p11 = por %p499_p8, %p498_p3 }
  0x76   : > { %p501_p0 = pnand %p500_p11, %p494_p10 }
  0x78   : > { %504 = shalt.err (!%p501_p0)
}
  0x79   : > { %384 = dma.vmem_to_hbm [thread:$0]  (%p817_p9), %s760_s30, 32, %s758_s12, %s273_s13  }
  0x7a PF: > { %s298_s3 = sand.u32 1, %s539_s6   ;;  %p818_p6 = scmp.ne.s32.totalorder %s814_s21, 0 }
  0x7b   : > { %p819_p13 = scmp.ge.s32.totalorder %s559_s11, 2  ;;  %s299_s4 = scalar_lea.sflag [#allocation4], %s298_s3 }
  0x7d   : > { %p391_p2 = pnand %p819_p13, %p818_p6 }
  0x7f   : > { %534 = dma.done.wait (!%p391_p2), %s299_s4, 32  }
  0x80   : > { %536 = vsyncadd (!%p391_p2), %s299_s4, 4294967264  ;;  %s17_s11 = sadd.s32 1, %s559_s11   ;;  %s820_s6 = smov %s543_s7 }
  0x81   : > { %p14_p5 = scmp.ge.s32.totalorder %s17_s11, 4   ;;  %s821_s7 = smov %s547_s8 }
  0x82   : > { %s822_s8 = smov %s632_s20  ;;  %s823_s9 = smov %s555_s10 }
  0x83   : > { %s824_s10 = smov %s826_s14  ;;  %16 = sbr.rel (!%p14_p5) target bundleno = 6 (0x6), region = 73 }
  0x8a   :  { %304 = vsyncpa [#allocation3], 1 }
  0x8b   :  { %306 = vsyncpa [#allocation3 + $0x1], 1 }
  0x8c   :  { %307 = vsyncpa [#allocation4], 1 }
  0x8d   :  { %309 = vsyncpa [#allocation4 + $0x1], 1 }

</bundles_post_ra>
